<compile_context>
chip_gen: v5e
topology: v5e:2x2
jax: 0.10.0
libtpu: 0.0.40
codegen_flags: <defaults>
</compile_context>

<pallas_src>
import jax
import jax.numpy as jnp
from jax.experimental import pallas as pl
from jax.experimental.pallas import tpu as pltpu


def _relu_conv_bn_kernel(x_ref, w_ref, b_ref, o_ref):
    """One (C_out, t_hw) output tile: W_folded @ relu(x_tile) + bias.

    x_ref : (C_in, t_hw)   activation tile (batch dim squeezed)
    w_ref : (C_out, C_in)  BN-folded conv weight, resident in VMEM
    b_ref : (C_out, 1)     BN-folded bias (f32), resident in VMEM
    o_ref : (C_out, t_hw)  output tile (batch dim squeezed)
    """
    # ReLU on the VPU; cast to the weight dtype for the MXU operand.
    xr = jnp.maximum(x_ref[...], 0.0).astype(w_ref.dtype)
    # Single MXU matmul with f32 accumulation; bias add in f32.
    y = jnp.dot(w_ref[...], xr, preferred_element_type=jnp.float32)
    o_ref[...] = (y + b_ref[...]).astype(o_ref.dtype)


def _pick_hw_tile(hw, c_in, c_out, itemsize, n_batch):
    """Largest lane-dense HW tile whose double-buffered in+out blocks fit a
    conservative VMEM budget (safe on v5e / v6e / v7x)."""
    budget = 12 * 1024 * 1024  # double-buffered x + out blocks
    if hw % 128 != 0:
        # Full-extent block is always legal; tail stores are masked.
        return hw
    t_hw = 128
    for cand in (4096, 2048, 1024, 512, 256, 128):
        if hw % cand == 0 and 2 * cand * (c_in + c_out) * itemsize <= budget:
            t_hw = cand
            break
    # Keep at least 2 grid blocks so both v7x TensorCores get work.
    if n_batch * (hw // t_hw) < 2 and t_hw % 256 == 0:
        t_hw //= 2
    return t_hw


def relu_conv_bn(x, conv_w, bn_gamma, bn_beta, bn_mean, bn_var, *,
                 stride=1, padding=0, eps=1e-5, compute_dtype=None):
    """Fused ReLU -> Conv2d(1x1, bias=False) -> BatchNorm2d (inference).

    x      : (N, C_in, H, W)       NCHW (matches PyTorch).
    conv_w : (C_out, C_in, 1, 1)
    BN params: per-channel (C_out,) running stats / affine params.
    compute_dtype: optional MXU operand dtype (e.g. jnp.bfloat16); cast is
                   done on the VMEM tile, not in HBM.  None -> x.dtype.
    """
    N, C_in, H, W = x.shape
    C_out, C_in_w, kh, kw = conv_w.shape
    assert C_in_w == C_in
    assert kh == 1 and kw == 1, "only the DARTS 1x1 ReLUConvBN form is fused"
    # TODO(synk): general KxK kernels would need an im2col stage before the matmul.

    # ---- Fold BN (inference form) into the conv weight / bias. ----
    scale = bn_gamma.astype(jnp.float32) / jnp.sqrt(bn_var.astype(jnp.float32) + eps)
    bias = bn_beta.astype(jnp.float32) - bn_mean.astype(jnp.float32) * scale
    w_mat = conv_w[:, :, 0, 0].astype(jnp.float32)              # (C_out, C_in)
    mxu_dtype = compute_dtype if compute_dtype is not None else x.dtype
    w_folded = (w_mat * scale[:, None]).astype(mxu_dtype)       # (C_out, C_in)
    b_col = bias.reshape(C_out, 1)                               # (C_out, 1) f32

    # ---- Spatial handling for the 1x1 conv (padding, then stride). ----
    # Conv2d pads the ReLU output with zeros; relu(0)=0 so padding x first is
    # equivalent.  Only executed when padding/stride are non-default.
    if padding:
        x = jnp.pad(x, ((0, 0), (0, 0), (padding, padding), (padding, padding)))
    if stride != 1:
        x = x[:, :, ::stride, ::stride]
    H_out, W_out = x.shape[2], x.shape[3]
    HW = H_out * W_out

    # ---- Free reshape: NCHW -> (N, C_in, H*W); channels stay on sublanes. --
    x3d = x.reshape(N, C_in, HW)

    itemsize = jnp.dtype(x.dtype).itemsize
    t_hw = _pick_hw_tile(HW, C_in, C_out, itemsize, N)
    grid = (N, pl.cdiv(HW, t_hw))

    out3d = pl.pallas_call(
        _relu_conv_bn_kernel,
        out_shape=jax.ShapeDtypeStruct((N, C_out, HW), x.dtype),
        grid=grid,
        in_specs=[
            # Activation tile in native layout; batch dim squeezed.
            pl.BlockSpec((None, C_in, t_hw), lambda n, j: (n, 0, j)),
            # Tiny folded weight / bias: full-extent, resident in VMEM.
            pl.BlockSpec((C_out, C_in), lambda n, j: (0, 0)),
            pl.BlockSpec((C_out, 1), lambda n, j: (0, 0)),
        ],
        out_specs=pl.BlockSpec((None, C_out, t_hw), lambda n, j: (n, 0, j)),
        compiler_params=pltpu.CompilerParams(
            dimension_semantics=("parallel", "parallel")),
    )(x3d, w_folded, b_col)

    # ---- Free reshape back to NCHW. ----
    return out3d.reshape(N, C_out, H_out, W_out)


def _reference(x, conv_w, gamma, beta, mean, var, *, stride=1, padding=0,
               eps=1e-5):
    """Pure-JAX reference: BN(Conv(ReLU(x))) in inference form."""
    xr = jnp.maximum(x, 0.0)
    y = jax.lax.conv_general_dilated(
        xr, conv_w, window_strides=(stride, stride),
        padding=((padding, padding), (padding, padding)),
        dimension_numbers=("NCHW", "OIHW", "NCHW"),
        precision=jax.lax.Precision.HIGHEST)
    scale = gamma / jnp.sqrt(var + eps)
    bias = beta - mean * scale
    return y * scale[None, :, None, None] + bias[None, :, None, None]


if __name__ == "__main__":
    key = jax.random.PRNGKey(0)
    k1, k2, k3, k4, k5, k6 = jax.random.split(key, 6)

    # Small DARTS-like preprocessing op: ReLUConvBN(C_in=16, C_out=32, 1, 1, 0)
    N, C_in, C_out, H, W = 2, 16, 32, 16, 16
    x = jax.random.normal(k1, (N, C_in, H, W), dtype=jnp.float32)
    conv_w = jax.random.normal(k2, (C_out, C_in, 1, 1), dtype=jnp.float32) * 0.1
    gamma = 1.0 + 0.1 * jax.random.normal(k3, (C_out,), dtype=jnp.float32)
    beta = 0.1 * jax.random.normal(k4, (C_out,), dtype=jnp.float32)
    mean = 0.1 * jax.random.normal(k5, (C_out,), dtype=jnp.float32)
    var = jax.random.uniform(k6, (C_out,), dtype=jnp.float32,
                             minval=0.5, maxval=1.5)

    y = relu_conv_bn(x, conv_w, gamma, beta, mean, var, stride=1, padding=0)
    jax.block_until_ready(y)

    y_ref = _reference(x, conv_w, gamma, beta, mean, var)
    assert y.shape == (N, C_out, H, W)
    assert y.dtype == x.dtype
    # Tolerance covers a possible bf16-pass MXU f32 matmul path.
    assert bool(jnp.allclose(y, y_ref, atol=2e-2, rtol=2e-2))
    print("KERNEL_OK")
</pallas_src>

<mosaic_0001>
module attributes {stable_mosaic.version = 11 : i64} {
  func.func @_relu_conv_bn_kernel(%arg0: i32, %arg1: i32, %arg2: memref<1x16x256xf32, #tpu.memory_space<vmem>>, %arg3: memref<32x16xf32, #tpu.memory_space<vmem>>, %arg4: memref<32x1xf32, #tpu.memory_space<vmem>>, %arg5: memref<1x32x256xf32, #tpu.memory_space<vmem>>) attributes {dimension_semantics = [#tpu.dimension_semantics<parallel>, #tpu.dimension_semantics<parallel>], iteration_bounds = array<i64: 2, 1>, scalar_prefetch = 0 : i64, scratch_operands = 0 : i64, tpu.core_type = #tpu.core_type<tc>, window_params = [{transform_indices = @transform_0, window_bounds = array<i64: 1, 16, 256>}, {pipeline_mode = #tpu.pipeline_mode<synchronous>, transform_indices = @transform_1, window_bounds = array<i64: 32, 16>}, {pipeline_mode = #tpu.pipeline_mode<synchronous>, transform_indices = @transform_2, window_bounds = array<i64: 32, 1>}, {transform_indices = @transform_3, window_bounds = array<i64: 1, 32, 256>}]} {
    %c0 = arith.constant 0 : index
    %c0_0 = arith.constant 0 : index
    %c0_1 = arith.constant 0 : index
    %0 = vector.load %arg2[%c0, %c0_0, %c0_1] : memref<1x16x256xf32, #tpu.memory_space<vmem>>, vector<1x16x256xf32>
    %1 = vector.shape_cast %0 : vector<1x16x256xf32> to vector<16x256xf32>
    %cst = arith.constant 0.000000e+00 : f32
    %2 = vector.broadcast %cst : f32 to vector<16x256xf32>
    %3 = arith.maximumf %1, %2 : vector<16x256xf32>
    %c0_2 = arith.constant 0 : index
    %c0_3 = arith.constant 0 : index
    %4 = vector.load %arg3[%c0_2, %c0_3] : memref<32x16xf32, #tpu.memory_space<vmem>>, vector<32x16xf32>
    %cst_4 = arith.constant dense<0.000000e+00> : vector<32x256xf32>
    %5 = tpu.matmul %4, %3, %cst_4 {dimension_numbers = #tpu.dot_dimension_numbers<[1], [0], [0], [1], [0, 0, 1, 1], [], []>} : vector<32x16xf32>, vector<16x256xf32>, vector<32x256xf32> -> vector<32x256xf32>
    %c0_5 = arith.constant 0 : index
    %c0_6 = arith.constant 0 : index
    %6 = vector.load %arg4[%c0_5, %c0_6] : memref<32x1xf32, #tpu.memory_space<vmem>>, vector<32x1xf32>
    %7 = vector.broadcast %6 : vector<32x1xf32> to vector<32x256xf32>
    %8 = arith.addf %5, %7 : vector<32x256xf32>
    %c0_7 = arith.constant 0 : index
    %c0_8 = arith.constant 0 : index
    %c0_9 = arith.constant 0 : index
    %9 = vector.load %arg5[%c0_7, %c0_8, %c0_9] : memref<1x32x256xf32, #tpu.memory_space<vmem>>, vector<1x32x256xf32>
    %10 = vector.shape_cast %9 : vector<1x32x256xf32> to vector<32x256xf32>
    %11 = vector.shape_cast %8 : vector<32x256xf32> to vector<1x32x256xf32>
    tpu.vector_store %arg5[%c0_7, %c0_8, %c0_9], %11 {strides = array<i32>} : memref<1x32x256xf32, #tpu.memory_space<vmem>>, vector<1x32x256xf32>,
    return
  }
  func.func @transform_0(%arg0: i32, %arg1: i32) -> (i32, i32, i32) {
    %c0_i32 = arith.constant 0 : i32
    %c0_i32_0 = arith.constant 0 : i32
    return %arg0, %c0_i32, %arg1 : i32, i32, i32
  }
  func.func @transform_1(%arg0: i32, %arg1: i32) -> (i32, i32) {
    %c0_i32 = arith.constant 0 : i32
    %c0_i32_0 = arith.constant 0 : i32
    %c0_i32_1 = arith.constant 0 : i32
    return %c0_i32, %c0_i32_0 : i32, i32
  }
  func.func @transform_2(%arg0: i32, %arg1: i32) -> (i32, i32) {
    %c0_i32 = arith.constant 0 : i32
    %c0_i32_0 = arith.constant 0 : i32
    %c0_i32_1 = arith.constant 0 : i32
    return %c0_i32, %c0_i32_0 : i32, i32
  }
  func.func @transform_3(%arg0: i32, %arg1: i32) -> (i32, i32, i32) {
    %c0_i32 = arith.constant 0 : i32
    %c0_i32_0 = arith.constant 0 : i32
    return %arg0, %c0_i32, %arg1 : i32, i32, i32
  }
}

</mosaic_0001>

<bundles_post_ra>
// kernel: tpu_custom_call.1
= control target key start
LH: loop header
LB: loop body
LE: loop exit
PB: predicated region body
PF: predicated region fallthrough
CT: control target
= control target key end

     0   :  { %8 = vsyncpa [#allocation3], 0  ;;  %s735_s0 = inlined_call_operand.vmem [shape: f32[2,16,256], index: 0, kind: input, shape index: {}]   ;;  %s736_s1 = inlined_call_operand.vmem [shape: f32[32,16], index: 1, kind: input, shape index: {}]   ;;  %s737_s2 = inlined_call_operand.vmem [shape: f32[32,1], index: 2, kind: input, shape index: {}]   ;;  %s738_s3 = inlined_call_operand.hbm [shape: f32[2,32,256], index: 3, kind: output, shape index: {}]  }
   0x1   :  { %10 = vsyncpa [#allocation3 + $0x1], 0  ;;  %s602_s12 = smov 0   ;;  %s604_s13 = smov 0  }
   0x2   :  { %s606_s14 = smov 0   ;;  %s608_s15 = smov 0  }
   0x3   :  { %s610_s16 = smov 0   ;;  %s612_s17 = smov 0  }
   0x4 LB: > { %s412_s18 = sadd.s32 4294967295, %s577_s17   ;;  %s413_s19 = sadd.s32 4294967294, %s577_s17   ;;  %s577_s17 = sphi %s612_s17, %s16_s17   ;;  %s573_s16 = sphi %s610_s16, %s745_s16   ;;  %s569_s15 = sphi %s608_s15, %s744_s15   ;;  %s565_s14 = sphi %s606_s14, %s743_s14   ;;  %s561_s13 = sphi %s604_s13, %s742_s13   ;;  %s557_s12 = sphi %s602_s12, %s741_s12  }
   0x5   : > { %s28_s20 = sadd.s32 1, %s573_s16  ;;  %s107_s21 = sadd.s32 1, %s565_s14 }
   0x6   : > { %p30_p0 = scmp.ge.s32.totalorder %s28_s20, 2  ;;  %p117_p1 = scmp.ne.s32.totalorder %s565_s14, %s561_s13 }
   0x7   : > { %p118_p2 = scmp.eq.s32.totalorder %s412_s18, 1  ;;  %p123_p3 = scmp.ne.s32.totalorder %s561_s13, %s557_s12 }
   0x8   : > { %s747_s20 = smov (%p30_p0, %s28_s20), 0  ;;  %p124_p5 = scmp.eq.s32.totalorder %s413_s19, 1 }
   0x9   : > { %p642_p4 = por %p118_p2, %p117_p1  ;;  %s102_s23 = ssub.s32 %s573_s16, %s747_s20 }
   0xa   : > { %p416_p6 = scmp.ge.s32.totalorder %s577_s17, 1  ;;  %p105_p7 = scmp.eq.s32.totalorder %s102_s23, 0 }
   0xb   : > { %p649_p8 = por %p124_p5, %p123_p3  ;;  %p161_p9 = scmp.lt.s32.totalorder %s577_s17, 3 }
   0xc   : > { %s655_s25 = scalar_select %p105_p7, %s565_s14, %s107_s21  }
   0xd   : > { %p162_p10 = pnand %p416_p6, %p161_p9 }
   0xe   : > { %p190_p11 = scmp.lt.s32.totalorder (!%p162_p10), %s569_s15, 1  ;;  %s434_s6 = sshll.u32 (!%p162_p10), %s569_s15, 6 }
   0xf   : > { %165 = sbr.rel (%p162_p10) target bundleno = 178 (0xb2), region = 32  ;;  %s329_s9 = scalar_lea.hbm (!%p162_p10), %s738_s3, %s434_s6 }
  0x10   : > { %s519_s26 = scalar_lea.hbm (!%p162_p10), %s738_s3, 128 }
  0x14   : > { %v579_v0 = vmov 0   ;;  %v214_v1 = vld [vmem:[%s737_s2 + $0x10] sm:$0xff]  ;;  %v212_v2 = vld [vmem:[%s737_s2] sm:$0xff]  ;;  %s191_s30 = scalar_select %p190_p11, %s569_s15, 1  ;;  %vm236_vm0 = vcmask 130048   ;;  %v215_v13 = vld [vmem:[%s737_s2 + $0x18] sm:$0xff] }
  0x15   : > { %498 = vset.pattern.permute.xlu1 %v579_v0  ;;  %497 = vset.pattern.permute.xlu0 %v579_v0  ;;  %v208_v11 = vld [vmem:[%s736_s1] sm:$0xff]  ;;  %v210_v12 = vld [vmem:[%s736_s1 + $0x10] sm:$0xff]  ;;  %v213_v14 = vld [vmem:[%s737_s2 + $0x8] sm:$0xff]  ;;  %s332_s15 = sshll.u32 %s329_s9, 4  ;;  %s333_s15 = int_to_ptr.hbm [resolvable:$true] %s332_s15 }
  0x16   : > { %228 = vperm.xlu1 %498, %v214_v1   ;;  %218 = vperm.xlu0 %497, %v212_v2   ;;  %s433_s4 = sshll.u32 %s191_s30, 5  ;;  %v209_v15 = vld [vmem:[%s736_s1 + $0x8] sm:$0xff]  ;;  %v211_v16 = vld [vmem:[%s736_s1 + $0x18] sm:$0xff]  ;;  %s186_s30 = sand.u32 1, %s561_s13  }
  0x17   : > { %s197_s7 = scalar_lea.vmem %s735_s0, %s433_s4  ;;  %s417_s4 = sshll.u32 %s186_s30, 6 }
  0x18   : > { %v202_v3 = vld [vmem:[%s197_s7 + $0x10] sm:$0xff]  ;;  %v203_v4 = vld [vmem:[%s197_s7 + $0x18] sm:$0xff]  ;;  %v200_v5 = vld [vmem:[%s197_s7] sm:$0xff]  ;;  %s188_s5 = scalar_lea.vmem [#allocation2], %s417_s4  ;;  %s316_s11 = scalar_lea.sflag [#allocation3], %s186_s30 }
  0x19   : > { %v206_v6 = vmax.f32 %v202_v3, 0.0  ;;  %v207_v7 = vmax.f32 %v203_v4, 0.0  ;;  %v204_v8 = vmax.f32 %v200_v5, 0.0  ;;  %v201_v9 = vld [vmem:[%s197_s7 + $0x8] sm:$0xff]  ;;  %s330_s10 = sshll.u32 %s188_s5, 4  ;;  %s513_s18 = sshra.s32 %s333_s15, 4  ;;  %s331_s10 = int_to_ptr.vmem [resolvable:$true] %s330_s10  ;;  %s514_s18 = int_to_ptr.hbm [resolvable:$true] %s513_s18 }
  0x1a   : > { %v205_v10 = vmax.f32 %v201_v9, 0.0  ;;  %s515_s19 = scalar_lea.hbm %s514_s18, 64  ;;  %p520_p1 = scmp.lt.s32.totalorder %s514_s18, %s738_s3 }
  0x1b   : > { %263 = vmatpush.msra.mxu0 %v206_v6  ;;  %435 = vmatpush.msra.mxu2 %v206_v6  ;;  %p516_p12 = scmp.ne.s32.totalorder %s514_s18, %s515_s19  ;;  %p521_p2 = scmp.lt.s32.totalorder %s519_s26, %s515_s19 }
  0x1c   : > { %292 = vmatpush.msra.mxu1 %v207_v7  ;;  %437 = vmatpush.msra.mxu3 %v207_v7 }
  0x1d   : > { %264 = vmatpush.msra.mxu0 %v204_v8  ;;  %436 = vmatpush.msra.mxu2 %v204_v8  ;;  %p517_p13 = pnand %p516_p12, %p642_p4  ;;  %p522_p3 = por %p521_p2, %p520_p1 }
  0x1e   : > { %293 = vmatpush.msra.mxu1 %v205_v10  ;;  %438 = vmatpush.msra.mxu3 %v205_v10 }
  0x1f   : > { %420 = vmatmul.msk.f32.vlgmr.msra.gmra.mxu0 %vm236_vm0, %v208_v11  ;;  %422 = vmatmul.msk.f32.vlgmr.msra.gmra.mxu2 %vm236_vm0, %v210_v12  ;;  %p518_p0 = pneg %p517_p13 }
  0x20   : > { %424 = vmatmul.msk.f32.vlgmr.msra.gmra.mxu1 %vm236_vm0, %v208_v11  ;;  %426 = vmatmul.msk.f32.vlgmr.msra.gmra.mxu3 %vm236_vm0, %v210_v12 }
  0x21   : > { %233 = vperm.xlu1 %498, %v215_v13   ;;  %223 = vperm.xlu0 %497, %v213_v14   ;;  %p523_p5 = pnand %p522_p3, %p518_p0 }
  0x27   : > { %421 = vmatmul.msk.f32.gmra.mxu0 %vm236_vm0, %v209_v15  ;;  %423 = vmatmul.msk.f32.gmra.mxu2 %vm236_vm0, %v211_v16 }
  0x28   : > { %425 = vmatmul.msk.f32.gmra.mxu1 %vm236_vm0, %v209_v15  ;;  %427 = vmatmul.msk.f32.gmra.mxu3 %vm236_vm0, %v211_v16 }
  0x88   : > { %v219_v17 = vpop.permute.xlu0 %218  ;;  %v229_v22 = vpop.permute.xlu1 %228 }
  0x93   : > { %v224_v26 = vpop.permute.xlu0 %223  ;;  %v234_v32 = vpop.permute.xlu1 %233 }
  0x9c   : > { %v266_v18 = vpop.f32.mrf.mxu0 }
  0x9d   : > { %v267_v19 = vadd.f32 %v266_v18, %v219_v17  ;;  %v295_v20 = vpop.f32.mrf.mxu1 }
  0x9e   : > { %v296_v21 = vadd.f32 %v295_v20, %v219_v17 }
  0x9f   : > { %307 = vst [vmem:[%s188_s5] sm:$0xff] %v267_v19 }
  0xa0   : > { %308 = vst [vmem:[%s188_s5 + $0x8] sm:$0xff] %v296_v21 }
  0xa2   : > { %v272_v23 = vpop.f32.mrf.mxu2 }
  0xa3   : > { %v273_v24 = vadd.f32 %v272_v23, %v229_v22  ;;  %v301_v25 = vpop.f32.mrf.mxu3 }
  0xa4   : > { %v302_v27 = vadd.f32 %v301_v25, %v229_v22  ;;  %v269_v28 = vpop.f32.mrf.mxu0 }
  0xa5   : > { %311 = vst [vmem:[%s188_s5 + $0x20] sm:$0xff] %v273_v24  ;;  %v270_v29 = vadd.f32 %v269_v28, %v224_v26  ;;  %v298_v30 = vpop.f32.mrf.mxu1 }
  0xa6   : > { %312 = vst [vmem:[%s188_s5 + $0x28] sm:$0xff] %v302_v27  ;;  %v299_v31 = vadd.f32 %v298_v30, %v224_v26 }
  0xa7   : > { %309 = vst [vmem:[%s188_s5 + $0x10] sm:$0xff] %v270_v29 }
  0xa8   : > { %310 = vst [vmem:[%s188_s5 + $0x18] sm:$0xff] %v299_v31 }
  0xaa   : > { %v275_v33 = vpop.f32.mrf.mxu2 }
  0xab   : > { %v276_v34 = vadd.f32 %v275_v33, %v234_v32  ;;  %v304_v35 = vpop.f32.mrf.mxu3 }
  0xac   : > { %v305_v36 = vadd.f32 %v304_v35, %v234_v32 }
  0xad   : > { %313 = vst [vmem:[%s188_s5 + $0x30] sm:$0xff] %v276_v34 }
  0xae   : > { %314 = vst [vmem:[%s188_s5 + $0x38] sm:$0xff] %v305_v36 }
  0xaf   : > { %526 = shalt.err (!%p523_p5)
}
  0xb0   : > { %s580_s29 = smov 256   ;;  %s581_s30 = smov 16  }
  0xb1   : > { %439 = dma.vmem_to_hbm [thread:$0]  (%p642_p4), %s331_s10, 1024, %s333_s15, %s316_s11, %s580_s29, %s580_s29, %s581_s30  }
  0xb2 PF: > { %p445_p6 = scmp.ge.s32.totalorder %s577_s17, 2  ;;  %s347_s4 = sand.u32 1, %s557_s12  }
  0xb3   : > { %s348_s5 = scalar_lea.sflag [#allocation3], %s347_s4 }
  0xb4   : > { %p442_p7 = pnand %p445_p6, %p649_p8 }
  0xb6   : > { %p443_p9 = pneg %p442_p7 }
  0xb8   : > { %552 = dma.done.wait (%p443_p9), %s348_s5, 1024  }
  0xb9   : > { %554 = vsyncadd (%p443_p9), %s348_s5, 4294966272  ;;  %s16_s17 = sadd.s32 1, %s577_s17   ;;  %s741_s12 = smov %s561_s13 }
  0xba   : > { %p13_p10 = scmp.ge.s32.totalorder %s16_s17, 4   ;;  %s742_s13 = smov %s565_s14 }
  0xbb   : > { %s743_s14 = smov %s655_s25  ;;  %s744_s15 = smov %s573_s16 }
  0xbc   : > { %s745_s16 = smov %s747_s20  ;;  %15 = sbr.rel (!%p13_p10) target bundleno = 4 (0x4), region = 67 }
  0xc1   :  { %354 = vsyncpa [#allocation3], 1 }
  0xc2   :  { %356 = vsyncpa [#allocation3 + $0x1], 1 }

</bundles_post_ra>
